<compile_context>
chip_gen: v7x
topology: tpu7x:2x2x1
jax: 0.10.0
libtpu: 0.0.40
codegen_flags: <defaults>
</compile_context>

<pallas_src>
import jax
import jax.numpy as jnp
from jax.experimental import pallas as pl
from jax.experimental.pallas import tpu as pltpu


def _decoder_kernel(mix_ref, mask_ref, w_ref, out_ref, last_ref, carry_ref):
    # mix_ref / mask_ref: (1, N, TK)       w_ref: (L, N)
    # out_ref:  (1, hop, TK)  segments t*TK .. t*TK+TK-1
    # last_ref: (1, hop, 1)   final segment (resident across the K axis)
    # carry_ref: VMEM (hop, 1) f32 — second half of the previous tile's last
    #            frame, carried across K tiles (the K axis runs sequentially).
    t = pl.program_id(1)

    prod = mix_ref[0] * mask_ref[0]                             # (N, TK)

    # est_T[l, k] = sum_n W[l, n] * prod[n, k]: canonical (L,N)x(N,TK) MXU
    # contraction — no transpose of the big operand, f32 accumulation.
    est_t = jnp.dot(w_ref[...], prod,
                    preferred_element_type=jnp.float32)         # (L, TK) f32

    L = w_ref.shape[0]
    hop = L // 2
    first = est_t[:hop, :]                                      # (hop, TK)
    second = est_t[hop:, :]                                     # (hop, TK)
    tk = second.shape[1]

    @pl.when(t == 0)
    def _():
        carry_ref[...] = jnp.zeros_like(carry_ref)

    # shifted[:, s] = second[:, s-1]; lane 0 takes the carry from the previous
    # K tile (zero at t == 0).  XLU lane-rotate + VPU select keeps the shift
    # off the load/store slots and avoids materializing an unaligned slice.
    rolled = pltpu.roll(second, shift=1, axis=1)
    lane = jax.lax.broadcasted_iota(jnp.int32, (hop, tk), 1)
    shifted = jnp.where(lane == 0, carry_ref[...], rolled)

    # overlap_and_add with hop = L // 2: out[:, s] = first[:, s] + second[:, s-1]
    out_ref[0] = (first + shifted).astype(out_ref.dtype)

    tail = second[:, tk - 1:]                                   # (hop, 1)
    carry_ref[...] = tail                                       # carry forward

    # Final segment: only the last K tile issues this narrow (hop, 1) store.
    @pl.when(t == pl.num_programs(1) - 1)
    def _():
        last_ref[0] = tail.astype(last_ref.dtype)


def _pick_block_k(K, N, in_bytes, *, input_budget_bytes=8 << 20, max_tk=4096):
    """Choose the frame tile TK and the padded frame count K_pad.

    TK targets ~input_budget_bytes of double-buffered input per grid step
    (2 inputs x 2 buffers x N x TK x in_bytes) so the ~0.35 us per-step fixed
    overhead is amortized, while keeping comfortable headroom under the
    scoped-VMEM limits on every generation (v5e 16 MiB default scoped,
    v7x 64 MiB physical).
    """
    target = input_budget_bytes // (4 * max(N, 1) * max(in_bytes, 1))
    target = int(min(target, max_tk))
    target = max(128, (target // 128) * 128)
    if K <= target:
        return K, K                         # one tile per batch element
    for tk in range(target, 127, -128):     # largest 128-aligned divisor
        if K % tk == 0:
            return tk, K
    # Ragged K: pad to a near-target, 128-aligned tile (zero frames are inert).
    n_tiles = pl.cdiv(K, target)
    tk = ((pl.cdiv(K, n_tiles) + 127) // 128) * 128
    return tk, n_tiles * tk


def decoder_forward(mixture_w, est_mask, weight, *, block_k=None,
                    input_buffer_count=None):
    """USEV Decoder forward.

    mixture_w, est_mask: (B, N, K).  weight: (L, N) = nn.Linear(N, L).weight
    in its native layout (no host-side transpose).  Returns
    (B, (K - 1) * (L // 2) + L), identical to the PyTorch module for even L.

    The kernel runs in the inputs' dtype: pass bf16 straight from the
    upstream producer to halve HBM read traffic.  No boundary astype is
    inserted here (a wrapper-side cast would add HBM traffic, not save it).
    """
    B, N, K = mixture_w.shape
    L, N_w = weight.shape
    assert N_w == N, "weight must be (L, N)"
    hop = L // 2
    assert L == 2 * hop, "overlap_and_add implemented for even L (hop = L//2)"
    # TODO(synk): odd L (frame_step != L/2) needs a general scatter-add overlap.

    out_dtype = mixture_w.dtype
    in_bytes = jnp.dtype(mixture_w.dtype).itemsize
    out_bytes = jnp.dtype(out_dtype).itemsize
    if est_mask.dtype != mixture_w.dtype:
        est_mask = est_mask.astype(mixture_w.dtype)
    if weight.dtype != mixture_w.dtype:          # (L, N) is tiny
        weight = weight.astype(mixture_w.dtype)

    if block_k is None:
        tk, k_pad = _pick_block_k(K, N, in_bytes)
    elif block_k >= K:
        tk, k_pad = K, K
    elif block_k % 128 == 0:
        tk, k_pad = block_k, pl.cdiv(K, block_k) * block_k
    else:
        raise ValueError("block_k must be a multiple of 128 or >= K")

    if k_pad != K:   # zero-padded frames contribute zeros to every segment
        pad = ((0, 0), (0, 0), (0, k_pad - K))
        mixture_w = jnp.pad(mixture_w, pad)
        est_mask = jnp.pad(est_mask, pad)
    num_k_tiles = k_pad // tk

    # Scoped-VMEM budget for the chosen tile (v5e's 16 MiB default is the
    # binding one); capped at 48 MiB so it also fits v7x's 64 MiB physical.
    n_in_buf = input_buffer_count if input_buffer_count is not None else 2
    vmem_bytes = (
        2 * n_in_buf * N * tk * in_bytes          # mixture_w + est_mask blocks
        + 2 * L * N * in_bytes                    # resident weight
        + 2 * (hop * tk + hop) * out_bytes        # main + last output blocks
        + (N + L) * tk * 4                        # prod / est_t intermediates
        + hop * 4                                 # carry scratch
    )
    vmem_limit = int(min(max(2 * vmem_bytes, 24 << 20), 48 << 20))

    def _in_spec():
        if input_buffer_count is None:
            return pl.BlockSpec((1, N, tk), lambda b, t: (b, 0, t))
        # Optional deeper input pipelining if a profile shows exposed DMA.
        return pl.BlockSpec((1, N, tk), lambda b, t: (b, 0, t),
                            pipeline_mode=pl.Buffered(input_buffer_count))

    main, last = pl.pallas_call(
        _decoder_kernel,
        out_shape=(
            jax.ShapeDtypeStruct((B, hop, k_pad), out_dtype),  # segs 0..k_pad-1
            jax.ShapeDtypeStruct((B, hop, 1), out_dtype),      # segment k_pad
        ),
        grid_spec=pltpu.PrefetchScalarGridSpec(
            num_scalar_prefetch=0,
            grid=(B, num_k_tiles),
            in_specs=[
                _in_spec(),
                _in_spec(),
                pl.BlockSpec((L, N), lambda b, t: (0, 0)),     # fetched once
            ],
            out_specs=[
                pl.BlockSpec((1, hop, tk), lambda b, t: (b, 0, t)),
                pl.BlockSpec((1, hop, 1), lambda b, t: (b, 0, 0)),
            ],
            scratch_shapes=[pltpu.VMEM((hop, 1), jnp.float32)],
        ),
        # TODO(synk): on v7x with B == 1, split the K axis across the two
        # TensorCores (independent zero-initialized carries + a one-segment
        # seam fix in the wrapper) so the second core is not idle.
        compiler_params=pltpu.CompilerParams(
            dimension_semantics=("parallel", "arbitrary"),
            vmem_limit_bytes=vmem_limit),
    )(mixture_w, est_mask, weight)

    # Segments 0..K: (B,hop,k_pad) ++ (B,hop,1) -> take K+1 -> (B,K+1,hop).
    # Output-side only (~L/(2N) of the kernel's HBM traffic); stays in XLA —
    # an in-kernel frame-major layout would need lane-width-hop stores.
    segs = jnp.concatenate([main, last], axis=2)[:, :, :K + 1]
    return jnp.transpose(segs, (0, 2, 1)).reshape(B, (K + 1) * hop)


def decoder_reference(mixture_w, est_mask, weight):
    """Pure-JAX reference mirroring the PyTorch forward (general overlap-add)."""
    est = (mixture_w * est_mask).astype(jnp.float32)
    w = weight.astype(jnp.float32)
    est = jnp.einsum('bnk,ln->bkl', est, w)              # (B, K, L)
    B, K, L = est.shape
    hop = L // 2
    T = (K - 1) * hop + L
    idx = (jnp.arange(K)[:, None] * hop + jnp.arange(L)[None, :]).reshape(-1)
    out = jnp.zeros((B, T), jnp.float32)
    return out.at[:, idx].add(est.reshape(B, K * L))


if __name__ == "__main__":
    key = jax.random.PRNGKey(0)
    k_mix, k_mask, k_w, k_mix2, k_mask2, k_mix3, k_mask3 = jax.random.split(key, 7)

    def make_inputs(kmix, kmask, B, N, K):
        mix = jax.random.normal(kmix, (B, N, K), dtype=jnp.float32)
        mask = jax.nn.sigmoid(
            jax.random.normal(kmask, (B, N, K), dtype=jnp.float32))
        return mix, mask

    # nn.Linear(N, L, bias=False).weight has shape (L, N)
    N, L = 32, 16
    weight = jax.random.normal(k_w, (L, N), dtype=jnp.float32) / (N ** 0.5)

    # Config 1: tiny module-consistent shapes (single K tile per batch).
    B, K = 2, 8
    mix, mask = make_inputs(k_mix, k_mask, B, N, K)
    out = decoder_forward(mix, mask, weight)
    jax.block_until_ready(out)
    ref = decoder_reference(mix, mask, weight)
    assert out.shape == ref.shape == (B, (K - 1) * (L // 2) + L)
    assert jnp.allclose(out, ref, atol=1e-3, rtol=1e-3), "f32 mismatch (cfg 1)"

    # Config 2: K tiled into two 128-frame blocks -> exercises the lane-dense
    # tiled stores, the cross-tile carry and the gated final-segment store.
    B2, K2 = 2, 256
    mix2, mask2 = make_inputs(k_mix2, k_mask2, B2, N, K2)
    out2 = decoder_forward(mix2, mask2, weight, block_k=128)
    jax.block_until_ready(out2)
    ref2 = decoder_reference(mix2, mask2, weight)
    assert out2.shape == ref2.shape == (B2, (K2 - 1) * (L // 2) + L)
    assert jnp.allclose(out2, ref2, atol=1e-3, rtol=1e-3), "f32 mismatch (cfg 2)"

    # Config 3: ragged K (not a multiple of the tile) -> wrapper zero-pads K
    # and slices the result; no untiled fallback block.
    B3, K3 = 2, 200
    mix3, mask3 = make_inputs(k_mix3, k_mask3, B3, N, K3)
    out3 = decoder_forward(mix3, mask3, weight, block_k=128)
    jax.block_until_ready(out3)
    ref3 = decoder_reference(mix3, mask3, weight)
    assert out3.shape == ref3.shape == (B3, (K3 - 1) * (L // 2) + L)
    assert jnp.allclose(out3, ref3, atol=1e-3, rtol=1e-3), "f32 mismatch (cfg 3)"

    # Config 4: bf16 inputs straight from the "producer" (no wrapper cast) —
    # the mem-bound fast path; MXU accumulates in f32, output is bf16.
    mix_bf = mix2.astype(jnp.bfloat16)
    mask_bf = mask2.astype(jnp.bfloat16)
    out4 = decoder_forward(mix_bf, mask_bf, weight, block_k=128)
    jax.block_until_ready(out4)
    assert out4.dtype == jnp.bfloat16
    ref4 = decoder_reference(mix_bf, mask_bf, weight)
    assert jnp.allclose(out4.astype(jnp.float32), ref4,
                        atol=5e-2, rtol=5e-2), "bf16 mismatch (cfg 4)"

    print("KERNEL_OK")
</pallas_src>

<mosaic_0001>
module attributes {stable_mosaic.version = 11 : i64} {
  func.func @_decoder_kernel(%arg0: i32, %arg1: i32, %arg2: memref<1x32x8xf32, #tpu.memory_space<vmem>>, %arg3: memref<1x32x8xf32, #tpu.memory_space<vmem>>, %arg4: memref<16x32xf32, #tpu.memory_space<vmem>>, %arg5: memref<1x8x8xf32, #tpu.memory_space<vmem>>, %arg6: memref<1x8x1xf32, #tpu.memory_space<vmem>>, %arg7: memref<8x1xf32, #tpu.memory_space<vmem>>) attributes {dimension_semantics = [#tpu.dimension_semantics<parallel>, #tpu.dimension_semantics<arbitrary>], iteration_bounds = array<i64: 2, 1>, scalar_prefetch = 0 : i64, scratch_operands = 1 : i64, tpu.core_type = #tpu.core_type<tc>, window_params = [{transform_indices = @transform_0, window_bounds = array<i64: 1, 32, 8>}, {transform_indices = @transform_1, window_bounds = array<i64: 1, 32, 8>}, {pipeline_mode = #tpu.pipeline_mode<synchronous>, transform_indices = @transform_2, window_bounds = array<i64: 16, 32>}, {transform_indices = @transform_3, window_bounds = array<i64: 1, 8, 8>}, {transform_indices = @transform_4, window_bounds = array<i64: 1, 8, 1>}]} {
    %c0 = arith.constant 0 : index
    %c0_0 = arith.constant 0 : index
    %c0_1 = arith.constant 0 : index
    %0 = vector.load %arg2[%c0, %c0_0, %c0_1] : memref<1x32x8xf32, #tpu.memory_space<vmem>>, vector<1x32x8xf32>
    %1 = vector.shape_cast %0 : vector<1x32x8xf32> to vector<32x8xf32>
    %c0_2 = arith.constant 0 : index
    %c0_3 = arith.constant 0 : index
    %c0_4 = arith.constant 0 : index
    %2 = vector.load %arg3[%c0_2, %c0_3, %c0_4] : memref<1x32x8xf32, #tpu.memory_space<vmem>>, vector<1x32x8xf32>
    %3 = vector.shape_cast %2 : vector<1x32x8xf32> to vector<32x8xf32>
    %4 = arith.mulf %1, %3 : vector<32x8xf32>
    %c0_5 = arith.constant 0 : index
    %c0_6 = arith.constant 0 : index
    %5 = vector.load %arg4[%c0_5, %c0_6] : memref<16x32xf32, #tpu.memory_space<vmem>>, vector<16x32xf32>
    %cst = arith.constant dense<0.000000e+00> : vector<16x8xf32>
    %6 = tpu.matmul %5, %4, %cst {dimension_numbers = #tpu.dot_dimension_numbers<[1], [0], [0], [1], [0, 0, 1, 1], [], []>} : vector<16x32xf32>, vector<32x8xf32>, vector<16x8xf32> -> vector<16x8xf32>
    %7 = vector.extract_strided_slice %6 {offsets = [0, 0], sizes = [8, 8], strides = [1, 1]} : vector<16x8xf32> to vector<8x8xf32>
    %8 = vector.extract_strided_slice %6 {offsets = [8, 0], sizes = [8, 8], strides = [1, 1]} : vector<16x8xf32> to vector<8x8xf32>
    %c0_i32 = arith.constant 0 : i32
    %9 = arith.cmpi eq, %arg1, %c0_i32 : i32
    %10 = arith.extui %9 : i1 to i32
    %c0_i32_7 = arith.constant 0 : i32
    %11 = arith.cmpi ne, %10, %c0_i32_7 : i32
    scf.if %11 {
      %cst_18 = arith.constant 0.000000e+00 : f32
      %29 = vector.broadcast %cst_18 : f32 to vector<8x1xf32>
      %c0_19 = arith.constant 0 : index
      %c0_20 = arith.constant 0 : index
      %30 = vector.load %arg7[%c0_19, %c0_20] : memref<8x1xf32, #tpu.memory_space<vmem>>, vector<8x1xf32>
      tpu.vector_store %arg7[%c0_19, %c0_20], %29 {strides = array<i32>} : memref<8x1xf32, #tpu.memory_space<vmem>>, vector<8x1xf32>,
    } else {
    }
    %c1_i32 = arith.constant 1 : i32
    %12 = tpu.dynamic_rotate %8 by %c1_i32 dim 1 : vector<8x8xf32>, i32 -> vector<8x8xf32>
    %13 = tpu.iota {dimensions = array<i32: 1>} : vector<8x8xi32>
    %c0_i32_8 = arith.constant 0 : i32
    %14 = vector.broadcast %c0_i32_8 : i32 to vector<8x8xi32>
    %15 = arith.cmpi eq, %13, %14 : vector<8x8xi32>
    %c0_9 = arith.constant 0 : index
    %c0_10 = arith.constant 0 : index
    %16 = vector.load %arg7[%c0_9, %c0_10] : memref<8x1xf32, #tpu.memory_space<vmem>>, vector<8x1xf32>
    %17 = vector.shape_cast %16 : vector<8x1xf32> to vector<8x1xf32>
    %18 = vector.broadcast %17 : vector<8x1xf32> to vector<8x8xf32>
    %19 = arith.select %15, %18, %12 : vector<8x8xi1>, vector<8x8xf32>
    %20 = arith.addf %7, %19 : vector<8x8xf32>
    %c0_11 = arith.constant 0 : index
    %c0_12 = arith.constant 0 : index
    %c0_13 = arith.constant 0 : index
    %21 = vector.load %arg5[%c0_11, %c0_12, %c0_13] : memref<1x8x8xf32, #tpu.memory_space<vmem>>, vector<1x8x8xf32>
    %22 = vector.shape_cast %21 : vector<1x8x8xf32> to vector<8x8xf32>
    %23 = vector.shape_cast %20 : vector<8x8xf32> to vector<1x8x8xf32>
    tpu.vector_store %arg5[%c0_11, %c0_12, %c0_13], %23 {strides = array<i32>} : memref<1x8x8xf32, #tpu.memory_space<vmem>>, vector<1x8x8xf32>,
    %24 = vector.extract_strided_slice %8 {offsets = [0, 7], sizes = [8, 1], strides = [1, 1]} : vector<8x8xf32> to vector<8x1xf32>
    %c0_14 = arith.constant 0 : index
    %c0_15 = arith.constant 0 : index
    %25 = vector.load %arg7[%c0_14, %c0_15] : memref<8x1xf32, #tpu.memory_space<vmem>>, vector<8x1xf32>
    tpu.vector_store %arg7[%c0_14, %c0_15], %24 {strides = array<i32>} : memref<8x1xf32, #tpu.memory_space<vmem>>, vector<8x1xf32>,
    %c0_i32_16 = arith.constant 0 : i32
    %26 = arith.cmpi eq, %arg1, %c0_i32_16 : i32
    %27 = arith.extui %26 : i1 to i32
    %c0_i32_17 = arith.constant 0 : i32
    %28 = arith.cmpi ne, %27, %c0_i32_17 : i32
    scf.if %28 {
      %c0_18 = arith.constant 0 : index
      %c0_19 = arith.constant 0 : index
      %c0_20 = arith.constant 0 : index
      %29 = vector.load %arg6[%c0_18, %c0_19, %c0_20] : memref<1x8x1xf32, #tpu.memory_space<vmem>>, vector<1x8x1xf32>
      %30 = vector.shape_cast %29 : vector<1x8x1xf32> to vector<8x1xf32>
      %31 = vector.shape_cast %24 : vector<8x1xf32> to vector<1x8x1xf32>
      tpu.vector_store %arg6[%c0_18, %c0_19, %c0_20], %31 {strides = array<i32>} : memref<1x8x1xf32, #tpu.memory_space<vmem>>, vector<1x8x1xf32>,
    } else {
    }
    return
  }
  func.func @transform_0(%arg0: i32, %arg1: i32) -> (i32, i32, i32) {
    %c0_i32 = arith.constant 0 : i32
    %c0_i32_0 = arith.constant 0 : i32
    return %arg0, %c0_i32, %arg1 : i32, i32, i32
  }
  func.func @transform_1(%arg0: i32, %arg1: i32) -> (i32, i32, i32) {
    %c0_i32 = arith.constant 0 : i32
    %c0_i32_0 = arith.constant 0 : i32
    return %arg0, %c0_i32, %arg1 : i32, i32, i32
  }
  func.func @transform_2(%arg0: i32, %arg1: i32) -> (i32, i32) {
    %c0_i32 = arith.constant 0 : i32
    %c0_i32_0 = arith.constant 0 : i32
    %c0_i32_1 = arith.constant 0 : i32
    return %c0_i32, %c0_i32_0 : i32, i32
  }
  func.func @transform_3(%arg0: i32, %arg1: i32) -> (i32, i32, i32) {
    %c0_i32 = arith.constant 0 : i32
    %c0_i32_0 = arith.constant 0 : i32
    return %arg0, %c0_i32, %arg1 : i32, i32, i32
  }
  func.func @transform_4(%arg0: i32, %arg1: i32) -> (i32, i32, i32) {
    %c0_i32 = arith.constant 0 : i32
    %c0_i32_0 = arith.constant 0 : i32
    %c0_i32_1 = arith.constant 0 : i32
    return %arg0, %c0_i32, %c0_i32_0 : i32, i32, i32
  }
}

</mosaic_0001>

<bundles_post_ra>
// kernel: tpu_custom_call.1
= control target key start
LH: loop header
LB: loop body
LE: loop exit
PB: predicated region body
PF: predicated region fallthrough
CT: control target
= control target key end

     0   :  { %10 = vsyncpa [#allocation4], 0  ;;  %s885_s0 = inlined_call_operand.vmem [shape: f32[2,32,8], index: 0, kind: input, shape index: {}]   ;;  %s886_s1 = inlined_call_operand.vmem [shape: f32[2,32,8], index: 1, kind: input, shape index: {}]   ;;  %s887_s2 = inlined_call_operand.vmem [shape: f32[16,32], index: 2, kind: input, shape index: {}]   ;;  %s888_s3 = inlined_call_operand.hbm [shape: f32[2,8,8], index: 3, kind: output, shape index: {0}]   ;;  %s889_s4 = inlined_call_operand.vmem [shape: f32[2,8,1], index: 4, kind: output, shape index: {1}]  }
   0x1   :  { %12 = vsyncpa [#allocation4 + $0x1], 0  ;;  %s752_s15 = smov 0   ;;  %s754_s16 = smov 0  }
   0x2   :  { %s756_s17 = smov 0   ;;  %s758_s18 = smov 0  }
   0x3   :  { %s760_s19 = smov 0   ;;  %s762_s20 = smov 0  }
   0x4 LB: > { %s537_s21 = sadd.s32 4294967295, %s720_s20   ;;  %s538_s22 = sadd.s32 4294967294, %s720_s20   ;;  %s720_s20 = sphi %s762_s20, %s18_s20   ;;  %s716_s19 = sphi %s760_s19, %s896_s19   ;;  %s712_s18 = sphi %s758_s18, %s895_s18   ;;  %s708_s17 = sphi %s756_s17, %s894_s17   ;;  %s704_s16 = sphi %s754_s16, %s893_s16   ;;  %s700_s15 = sphi %s752_s15, %s892_s15  }
   0x5   : > { %s30_s23 = sadd.s32 1, %s716_s19  ;;  %s116_s24 = sadd.s32 1, %s708_s17 }
   0x6   : > { %p32_p0 = scmp.ge.s32.totalorder %s30_s23, 2  ;;  %p126_p1 = scmp.ne.s32.totalorder %s708_s17, %s704_s16 }
   0x7   : > { %p127_p2 = scmp.eq.s32.totalorder %s537_s21, 1  ;;  %p132_p3 = scmp.ne.s32.totalorder %s704_s16, %s700_s15 }
   0x8   : > { %s898_s23 = smov (%p32_p0, %s30_s23), 0  ;;  %p133_p5 = scmp.eq.s32.totalorder %s538_s22, 1 }
   0x9   : > { %p792_p4 = por %p127_p2, %p126_p1  ;;  %s111_s26 = ssub.s32 %s716_s19, %s898_s23 }
   0xa   : > { %p541_p6 = scmp.ge.s32.totalorder %s720_s20, 1  ;;  %p114_p7 = scmp.eq.s32.totalorder %s111_s26, 0 }
   0xb   : > { %p799_p8 = por %p133_p5, %p132_p3  ;;  %p202_p9 = scmp.lt.s32.totalorder %s720_s20, 3 }
   0xc   : > { %s805_s28 = scalar_select %p114_p7, %s708_s17, %s116_s24  }
   0xd   : > { %p203_p10 = pnand %p541_p6, %p202_p9 }
   0xe   : > { %p243_p11 = scmp.lt.s32.totalorder (!%p203_p10), %s712_s18, 1  ;;  %v275_v0 = vld [vmem:[%s887_s2] sm:$0xff] (!%p203_p10)  ;;  %vm277_vm0 = vcmask (!%p203_p10), 261120   ;;  %v276_v15 = vld [vmem:[%s887_s2 + $0x8] sm:$0xff] (!%p203_p10)  ;;  %vm363_vm1 = vcmask (!%p203_p10), 7168   ;;  %v722_v16 = vmov (!%p203_p10), 0   ;;  %v372_v26 = vlaneseq (!%p203_p10) }
   0xf   : > { %206 = sbr.rel (%p203_p10) target bundleno = 616 (0x268), region = 32  ;;  %570 = vmatprep.mubr.msk.f32.mxu0 (!%p203_p10), %vm277_vm0, %v275_v0  ;;  %640 = vset.pattern.permute.xlu1 (!%p203_p10), %v722_v16  ;;  %v723_v17 = vmov (!%p203_p10), 0.0   ;;  %s724_s21 = smov (!%p203_p10), 8   ;;  %vm365_vm2 = vcmask (!%p203_p10), 1047616   ;;  %vm387_vm4 = vcmask (!%p203_p10), 64512  }
  0x10   : > { %364 = vst.msk [vmem:[#allocation2] sm:$0xff] (!%p203_p10), %vm363_vm1, %v723_v17  ;;  %641 = vset.pattern.permute.xlu0 (!%p203_p10), %v722_v16  ;;  %s725_s22 = smov (!%p203_p10), 121   ;;  %v373_v28 = vand.u32 (!%p203_p10), 127, %v372_v26 }
  0x12   : > { %vm374_vm3 = vcmp.eq.s32.totalorder (!%p203_p10), %v373_v28, 0 }
  0x16   : > { %s813_s5 = scalar_select %p243_p11, %s712_s18, 1 }
  0x17   : > { %v375_v20 = vld [vmem:[#allocation2] sm:$0xff] }
  0x18   : > { %s554_s6 = sshll.u32 %s813_s5, 5  ;;  %378 = vperm.xlu1 %640, %v375_v20   ;;  %s547_s24 = sshll.u32 %s813_s5, 3 }
  0x19   : > { %s250_s9 = scalar_lea.vmem %s885_s0, %s554_s6  ;;  %s258_s12 = scalar_lea.vmem %s886_s1, %s554_s6 }
  0x1a   : > { %v263_v1 = vld [vmem:[%s250_s9] sm:$0xff]  ;;  %v264_v2 = vld [vmem:[%s250_s9 + $0x8] sm:$0xff]  ;;  %v265_v6 = vld [vmem:[%s250_s9 + $0x10] sm:$0xff]  ;;  %s262_s30 = scalar_lea.vmem %s889_s4, %s547_s24  ;;  %s234_s6 = sand.u32 1, %s704_s16  }
  0x1b   : > { %v267_v3 = vld [vmem:[%s258_s12] sm:$0xff]  ;;  %v268_v4 = vld [vmem:[%s258_s12 + $0x8] sm:$0xff]  ;;  %v266_v7 = vld [vmem:[%s250_s9 + $0x18] sm:$0xff]  ;;  %s542_s7 = sshll.u32 %s234_s6, 3  ;;  %s551_s5 = sshll.u32 %s712_s18, 7 }
  0x1c   : > { %v271_v5 = vmul.f32 %v267_v3, %v263_v1  ;;  %v272_v8 = vmul.f32 %v268_v4, %v264_v2  ;;  %v269_v9 = vld [vmem:[%s258_s12 + $0x10] sm:$0xff]  ;;  %v270_v10 = vld [vmem:[%s258_s12 + $0x18] sm:$0xff]  ;;  %s236_s8 = scalar_lea.vmem [#allocation3], %s542_s7  ;;  %s838_s12 = scalar_lea.hbm %s888_s3, %s551_s5 }
  0x1d   : > { %v273_v11 = vmul.f32 %v269_v9, %v265_v6  ;;  %v274_v12 = vmul.f32 %v270_v10, %v266_v7  ;;  %s418_s9 = sshll.u32 %s236_s8, 4  ;;  %s400_s13 = scalar_lea.sflag [#allocation4], %s234_s6  ;;  %s840_s9 = int_to_ptr.vmem [resolvable:$true] %s418_s9 }
  0x1e   : > { %v573_v13 = vpack.c.bf16 %v272_v8, %v271_v5  ;;  %s642_s14 = scalar_lea.vmem %s840_s9, 128  ;;  %s726_s18 = smov [#allocation3]  }
  0x1f   : > { %v577_v14 = vpack.c.bf16 %v274_v12, %v273_v11  ;;  %p643_p12 = scmp.ne.s32.totalorder %s840_s9, %s642_s14 }
  0x20   : > { %574 = vmatprep.subr.bf16.mxu0 %v573_v13 }
  0x21   : > { %576 = vmatpush3.bf16.msra.mxu0 %v573_v13  ;;  %p644_p13 = pnand %p643_p12, %p792_p4 }
  0x22   : > { %578 = vmatprep.subr.bf16.mxu0 %v577_v14 }
  0x23   : > { %p645_p0 = pneg %p644_p13 }
  0x25   : > { %580 = vmatpush3.bf16.msra.mxu0 %v577_v14 }
  0x28   : > { %571 = vmatmul.mubr.msk.f32.vlgmr.msra.gmra.mrb[0].mxu0 %vm277_vm0, %v276_v15 }
  0x97   : > { %v379_v27 = vpop.permute.xlu1 %378 }
  0xfb   : > { %v572_v18 = vpop.f32.mrb[0].mxu0 }
  0xfc   : > { %366 = vrot.lane.b32.xlu0 %v572_v18, %s724_s21  ;;  %v350_v19 = vpop.f32.mrb[1].mxu0 }
 0x16e   : > { %v367_v21 = vpop.permute.xlu0 %366 }
 0x16f   : > { %v368_v22 = vsel %vm365_vm2, %v367_v21, %v572_v18 }
 0x170   : > { %369 = vrot.lane.b32.xlu0 %v368_v22, %s724_s21  ;;  %s646_s21 = sshll.u32 %s726_s18, 4  ;;  %s647_s21 = int_to_ptr.vmem [resolvable:$false] %s646_s21 }
 0x171   : > { %p649_p1 = scmp.lt.s32.totalorder %s840_s9, %s647_s21 }
 0x174   : > { %390 = vrot.lane.b32.xlu0 %v572_v18, %s725_s22 }
 0x1e2   : > { %v370_v23 = vpop.permute.xlu0 %369 }
 0x1e3   : > { %v371_v24 = vsel %vm365_vm2, %v370_v23, %v572_v18 }
 0x1e4   : > { %382 = vrot.lane.b32.xlu1 %v371_v24, %s725_s22  ;;  %s648_s22 = scalar_lea.vmem %s647_s21, 256 }
 0x1e5   : > { %p650_p2 = scmp.lt.s32.totalorder %s648_s22, %s642_s14 }
 0x1e6   : > { %v391_v25 = vpop.permute.xlu0 %390 }
 0x1e7   : > { %394 = vst.msk [vmem:[#allocation2] sm:$0xff] %vm363_vm1, %v391_v25  ;;  %398 = vst.msk [vmem:[%s262_s30] sm:$0xff] %vm363_vm1, %v391_v25  ;;  %p651_p3 = por %p650_p2, %p649_p1 }
 0x1e9   : > { %p652_p5 = pnand %p651_p3, %p645_p0 }
 0x256   : > { %v383_v29 = vpop.permute.xlu1 %382 }
 0x257   : > { %v385_v30 = vsel %vm374_vm3, %v379_v27, %v383_v29 }
 0x258   : > { %v386_v31 = vadd.f32 %v385_v30, %v350_v19 }
 0x25a   : > { %388 = vst.msk [vmem:[%s236_s8] sm:$0xff] %vm387_vm4, %v386_v31 }
 0x25b   : > { %655 = shalt.err (!%p652_p5)
}
 0x25c   : > { %s656_s24 = scalar_lea.hbm %s838_s12, 128  ;;  %s660_s30 = scalar_lea.hbm %s888_s3, 256 }
 0x25d   : > { %p657_p6 = scmp.ne.s32.totalorder %s838_s12, %s656_s24  ;;  %p661_p10 = scmp.lt.u32.totalorder %s838_s12, %s888_s3 }
 0x25e   : > { %p662_p11 = scmp.lt.u32.totalorder %s660_s30, %s656_s24  ;;  %p664_p13 = scmp.lt.u32.totalorder %s656_s24, %s838_s12 }
 0x25f   : > { %p658_p7 = pnand %p657_p6, %p792_p4 }
 0x260   : > { %p663_p12 = por %p662_p11, %p661_p10 }
 0x261   : > { %p659_p9 = pneg %p658_p7 }
 0x262   : > { %p665_p0 = por %p664_p13, %p663_p12 }
 0x264   : > { %p666_p1 = pnand %p665_p0, %p659_p9 }
 0x266   : > { %669 = shalt.err (!%p666_p1)
}
 0x267   : > { %581 = dma.vmem_to_hbm [thread:$0]  (%p792_p4), %s840_s9, 128, %s838_s12, %s400_s13  }
 0x268 PF: > { %p587_p2 = scmp.ge.s32.totalorder %s720_s20, 2  ;;  %s433_s5 = sand.u32 1, %s700_s15  }
 0x269   : > { %s434_s8 = scalar_lea.sflag [#allocation4], %s433_s5 }
 0x26a   : > { %p584_p3 = pnand %p587_p2, %p799_p8 }
 0x26c   : > { %695 = dma.done.wait (!%p584_p3), %s434_s8, 128  }
 0x26d   : > { %697 = vsyncadd (!%p584_p3), %s434_s8, 4294967168  ;;  %s18_s20 = sadd.s32 1, %s720_s20   ;;  %s892_s15 = smov %s704_s16 }
 0x26e   : > { %p15_p5 = scmp.ge.s32.totalorder %s18_s20, 4   ;;  %s893_s16 = smov %s708_s17 }
 0x26f   : > { %s894_s17 = smov %s805_s28  ;;  %s895_s18 = smov %s716_s19 }
 0x270   : > { %s896_s19 = smov %s898_s23  ;;  %17 = sbr.rel (!%p15_p5) target bundleno = 4 (0x4), region = 90 }
 0x277   :  { %446 = vsyncpa [#allocation4], 1 }
 0x278   :  { %448 = vsyncpa [#allocation4 + $0x1], 1 }

</bundles_post_ra>
